<compile_context>
chip_gen: v7x
topology: tpu7x:2x2x1
jax: 0.10.0
libtpu: 0.0.40
codegen_flags: <defaults>
</compile_context>

<pallas_src>
import functools

import jax
import jax.numpy as jnp
from jax.experimental import pallas as pl
from jax.experimental.pallas import tpu as pltpu

_LANES = 128
_SUBLANE_ALIGN = 32          # covers int8 sublane packing and f32/bf16 requirements
_APPROX_RECIP = True         # EUP approx reciprocal for the softmax denominator


def _round_up(a, b):
    return ((a + b - 1) // b) * b


def _softmax_compute_dtype(x_dtype):
    """bf16 softmax front-end only where the VPU/EUP support it (v6e / v7x)."""
    if x_dtype != jnp.bfloat16:
        return jnp.float32
    try:
        kind = jax.devices()[0].device_kind.lower()
    except Exception:  # pragma: no cover - be conservative
        return jnp.float32
    if any(old in kind for old in ("v2", "v3", "v4", "v5")):
        return jnp.float32
    return jnp.bfloat16


def _tile_rows(rows, nclass, x_bytes, lbl_bytes, vmem_budget_bytes):
    """Rows-of-128-lanes per tile, sized for the VMEM budget and minimal padding."""
    # Double-buffered input tiles + a handful of (tr, 128) f32 streaming temporaries.
    per_row = 2 * (nclass * _LANES * x_bytes + _LANES * lbl_bytes) + 8 * _LANES * 4
    tr_budget = (vmem_budget_bytes // per_row) // _SUBLANE_ALIGN * _SUBLANE_ALIGN
    tr_budget = max(_SUBLANE_ALIGN, min(2048, tr_budget))
    num_tiles = pl.cdiv(rows, tr_budget)
    # Spread rows evenly over the tiles so padding (if any) is < 32 rows per tile,
    # and typical shapes (rows a multiple of num_tiles*32) need no padding at all.
    tr = _round_up(pl.cdiv(rows, num_tiles), _SUBLANE_ALIGN)
    return tr, num_tiles


def _dice_kernel(x_ref, t_ref, o_ref, inter_acc, sp_acc, st_acc, *,
                 nclass, pad_pixels, softmax_dtype):
    """Grid = (batch, hw_tiles); one (C, tr, 128) logits tile per step.

    x_ref:  (1, C, tr, 128) logits, native dtype
    t_ref:  (1, tr, 128)    int8/int32 labels; -1 marks padded pixels
    o_ref:  (1, 1, 1)       f32 per-batch sum_c dice (written on the last tile)
    *_acc:  (C, 128)        f32 lane-partial accumulators (VMEM scratch)
    """
    s_idx = pl.program_id(1)

    @pl.when(s_idx == 0)
    def _():
        inter_acc[...] = jnp.zeros_like(inter_acc)
        sp_acc[...] = jnp.zeros_like(sp_acc)
        st_acc[...] = jnp.zeros_like(st_acc)

    # ---- pass 1: streaming softmax statistics (max over C, sum of exp) ----
    m = x_ref[0, 0].astype(softmax_dtype)                       # (tr, 128)
    for c in range(1, nclass):
        m = jnp.maximum(m, x_ref[0, c].astype(softmax_dtype))
    den = None
    for c in range(nclass):
        e = jnp.exp(x_ref[0, c].astype(softmax_dtype) - m).astype(jnp.float32)
        den = e if den is None else den + e
    inv_den = pl.reciprocal(den, approx=_APPROX_RECIP)          # (tr, 128) f32

    # ---- pass 2: per-class probabilities + partial reductions ----
    t = t_ref[0].astype(jnp.int32)                              # (tr, 128); -1 = padding
    for c in range(nclass):
        p = jnp.exp(x_ref[0, c].astype(softmax_dtype) - m).astype(jnp.float32) * inv_den
        oh = (t == c).astype(jnp.float32)                       # padding never matches
        inter_acc[c:c + 1, :] += jnp.sum(oh * p, axis=0, keepdims=True)
        sp_acc[c:c + 1, :] += jnp.sum(p, axis=0, keepdims=True)
        st_acc[c:c + 1, :] += jnp.sum(oh, axis=0, keepdims=True)

    # ---- finalize on the last HW tile ----
    @pl.when(s_idx == pl.num_programs(1) - 1)
    def _():
        smooth = jnp.float32(1.0)
        inter = jnp.sum(inter_acc[...], axis=1, keepdims=True)   # (C, 1)
        sp = jnp.sum(sp_acc[...], axis=1, keepdims=True)         # (C, 1)
        st = jnp.sum(st_acc[...], axis=1, keepdims=True)         # (C, 1)
        if pad_pixels:
            # Padded pixels have all-zero logits, so each contributes exactly
            # reciprocal(C) (same approx op as inv_den) to every class's sum(p).
            inv_c = pl.reciprocal(jnp.full((1, 1), float(nclass), jnp.float32),
                                  approx=_APPROX_RECIP)
            sp = sp - jnp.float32(pad_pixels) * inv_c
        dice = (2.0 * inter + smooth) / (sp + st + smooth)       # (C, 1)
        o_ref[0] = jnp.sum(dice, axis=0, keepdims=True)          # (1, 1)


def multiclass_dice_loss(x, target, *, vmem_budget_bytes=20 * 1024 * 1024):
    """x: (N, C, H, W) float logits; target: (N, H, W) integer class labels in [0, C)."""
    N, C, H, W = x.shape
    HW = H * W

    label_dtype = jnp.int8 if C <= 127 else jnp.int32          # 4x less label HBM traffic
    x_bytes = jnp.dtype(x.dtype).itemsize
    lbl_bytes = jnp.dtype(label_dtype).itemsize

    rows = pl.cdiv(HW, _LANES)
    tr, num_tiles = _tile_rows(rows, C, x_bytes, lbl_bytes, vmem_budget_bytes)
    rows_pad = tr * num_tiles
    hw_pad = rows_pad * _LANES
    pad_pixels = hw_pad - HW

    x2 = x.reshape(N, C, HW)                                    # keep native dtype
    t2 = target.astype(label_dtype).reshape(N, HW)
    if pad_pixels:
        # Only triggers for awkward H*W (the tiling above avoids it for typical shapes).
        x2 = jnp.pad(x2, ((0, 0), (0, 0), (0, pad_pixels)))
        t2 = jnp.pad(t2, ((0, 0), (0, pad_pixels)), constant_values=-1)
    x3 = x2.reshape(N, C, rows_pad, _LANES)
    t3 = t2.reshape(N, rows_pad, _LANES)

    kernel = functools.partial(
        _dice_kernel, nclass=C, pad_pixels=pad_pixels,
        softmax_dtype=_softmax_compute_dtype(x.dtype))

    dice_sums = pl.pallas_call(
        kernel,
        out_shape=jax.ShapeDtypeStruct((N, 1, 1), jnp.float32),
        grid=(N, num_tiles),
        in_specs=[
            pl.BlockSpec((1, C, tr, _LANES), lambda n, s: (n, 0, s, 0)),
            pl.BlockSpec((1, tr, _LANES), lambda n, s: (n, s, 0)),
        ],
        out_specs=pl.BlockSpec((1, 1, 1), lambda n, s: (n, 0, 0)),
        scratch_shapes=[
            pltpu.VMEM((C, _LANES), jnp.float32),   # intersection partials
            pltpu.VMEM((C, _LANES), jnp.float32),   # sum(p) partials
            pltpu.VMEM((C, _LANES), jnp.float32),   # sum(one-hot) partials
        ],
        compiler_params=pltpu.CompilerParams(
            dimension_semantics=("parallel", "arbitrary"),
            vmem_limit_bytes=48 * 1024 * 1024),
    )(x3, t3)

    # total_loss = sum_c (1 - (1/N) sum_n dice[n, c]) = C - (1/N) * sum_{n,c} dice[n, c]
    return jnp.float32(C) - jnp.sum(dice_sums) / jnp.float32(N)


def _reference_loss(x, target):
    """Pure-JAX reference mirroring the PyTorch module exactly."""
    N, C, H, W = x.shape
    logits = jax.nn.softmax(x.astype(jnp.float32), axis=1)
    t_oh = jax.nn.one_hot(target, C, dtype=jnp.float32).transpose(0, 3, 1, 2)
    total = jnp.float32(0.0)
    for i in range(C):
        inp = logits[:, i].reshape(N, -1)
        tgt = t_oh[:, i].reshape(N, -1)
        inter = jnp.sum(inp * tgt, axis=1)
        dice = (2.0 * inter + 1.0) / (jnp.sum(inp, axis=1) + jnp.sum(tgt, axis=1) + 1.0)
        total = total + (1.0 - jnp.sum(dice) / N)
    return total


if __name__ == "__main__":
    key = jax.random.PRNGKey(0)
    k1, k2 = jax.random.split(key)

    N, C, H, W = 2, 4, 16, 16
    x = jax.random.normal(k1, (N, C, H, W), dtype=jnp.float32)
    target = jax.random.randint(k2, (N, H, W), 0, C, dtype=jnp.int32)

    loss = jax.block_until_ready(multiclass_dice_loss(x, target))
    ref = jax.block_until_ready(_reference_loss(x, target))
    # Tolerance is loosened vs the f32 reference because the kernel uses the EUP
    # approximate reciprocal for the softmax denominator (real bugs are >> 1e-1 here).
    assert jnp.allclose(loss, ref, atol=2e-2, rtol=2e-2), (loss, ref)

    print("KERNEL_OK")
</pallas_src>

<mosaic_0001>
module attributes {stable_mosaic.version = 11 : i64} {
  func.func @_dice_kernel(%arg0: i32, %arg1: i32, %arg2: memref<1x4x32x128xf32, #tpu.memory_space<vmem>>, %arg3: memref<1x32x128xi8, #tpu.memory_space<vmem>>, %arg4: memref<1x1x1xf32, #tpu.memory_space<vmem>>, %arg5: memref<4x128xf32, #tpu.memory_space<vmem>>, %arg6: memref<4x128xf32, #tpu.memory_space<vmem>>, %arg7: memref<4x128xf32, #tpu.memory_space<vmem>>) attributes {dimension_semantics = [#tpu.dimension_semantics<parallel>, #tpu.dimension_semantics<arbitrary>], iteration_bounds = array<i64: 2, 1>, scalar_prefetch = 0 : i64, scratch_operands = 3 : i64, tpu.core_type = #tpu.core_type<tc>, window_params = [{transform_indices = @transform_0, window_bounds = array<i64: 1, 4, 32, 128>}, {transform_indices = @transform_1, window_bounds = array<i64: 1, 32, 128>}, {transform_indices = @transform_2, window_bounds = array<i64: 1, 1, 1>}]} {
    %c0_i32 = arith.constant 0 : i32
    %0 = arith.cmpi eq, %arg1, %c0_i32 : i32
    %1 = arith.extui %0 : i1 to i32
    %c0_i32_0 = arith.constant 0 : i32
    %2 = arith.cmpi ne, %1, %c0_i32_0 : i32
    scf.if %2 {
      %cst_110 = arith.constant 0.000000e+00 : f32
      %140 = vector.broadcast %cst_110 : f32 to vector<4x128xf32>
      %c0_111 = arith.constant 0 : index
      %c0_112 = arith.constant 0 : index
      %141 = vector.load %arg5[%c0_111, %c0_112] : memref<4x128xf32, #tpu.memory_space<vmem>>, vector<4x128xf32>
      tpu.vector_store %arg5[%c0_111, %c0_112], %140 {strides = array<i32>} : memref<4x128xf32, #tpu.memory_space<vmem>>, vector<4x128xf32>,
      %cst_113 = arith.constant 0.000000e+00 : f32
      %142 = vector.broadcast %cst_113 : f32 to vector<4x128xf32>
      %c0_114 = arith.constant 0 : index
      %c0_115 = arith.constant 0 : index
      %143 = vector.load %arg6[%c0_114, %c0_115] : memref<4x128xf32, #tpu.memory_space<vmem>>, vector<4x128xf32>
      tpu.vector_store %arg6[%c0_114, %c0_115], %142 {strides = array<i32>} : memref<4x128xf32, #tpu.memory_space<vmem>>, vector<4x128xf32>,
      %cst_116 = arith.constant 0.000000e+00 : f32
      %144 = vector.broadcast %cst_116 : f32 to vector<4x128xf32>
      %c0_117 = arith.constant 0 : index
      %c0_118 = arith.constant 0 : index
      %145 = vector.load %arg7[%c0_117, %c0_118] : memref<4x128xf32, #tpu.memory_space<vmem>>, vector<4x128xf32>
      tpu.vector_store %arg7[%c0_117, %c0_118], %144 {strides = array<i32>} : memref<4x128xf32, #tpu.memory_space<vmem>>, vector<4x128xf32>,
    } else {
    }
    %c0 = arith.constant 0 : index
    %c0_1 = arith.constant 0 : index
    %c0_2 = arith.constant 0 : index
    %c0_3 = arith.constant 0 : index
    %3 = vector.load %arg2[%c0, %c0_1, %c0_2, %c0_3] : memref<1x4x32x128xf32, #tpu.memory_space<vmem>>, vector<1x1x32x128xf32>
    %4 = vector.shape_cast %3 : vector<1x1x32x128xf32> to vector<32x128xf32>
    %c0_4 = arith.constant 0 : index
    %c1 = arith.constant 1 : index
    %c0_5 = arith.constant 0 : index
    %c0_6 = arith.constant 0 : index
    %5 = vector.load %arg2[%c0_4, %c1, %c0_5, %c0_6] : memref<1x4x32x128xf32, #tpu.memory_space<vmem>>, vector<1x1x32x128xf32>
    %6 = vector.shape_cast %5 : vector<1x1x32x128xf32> to vector<32x128xf32>
    %7 = arith.maximumf %4, %6 : vector<32x128xf32>
    %c0_7 = arith.constant 0 : index
    %c2 = arith.constant 2 : index
    %c0_8 = arith.constant 0 : index
    %c0_9 = arith.constant 0 : index
    %8 = vector.load %arg2[%c0_7, %c2, %c0_8, %c0_9] : memref<1x4x32x128xf32, #tpu.memory_space<vmem>>, vector<1x1x32x128xf32>
    %9 = vector.shape_cast %8 : vector<1x1x32x128xf32> to vector<32x128xf32>
    %10 = arith.maximumf %7, %9 : vector<32x128xf32>
    %c0_10 = arith.constant 0 : index
    %c3 = arith.constant 3 : index
    %c0_11 = arith.constant 0 : index
    %c0_12 = arith.constant 0 : index
    %11 = vector.load %arg2[%c0_10, %c3, %c0_11, %c0_12] : memref<1x4x32x128xf32, #tpu.memory_space<vmem>>, vector<1x1x32x128xf32>
    %12 = vector.shape_cast %11 : vector<1x1x32x128xf32> to vector<32x128xf32>
    %13 = arith.maximumf %10, %12 : vector<32x128xf32>
    %c0_13 = arith.constant 0 : index
    %c0_14 = arith.constant 0 : index
    %c0_15 = arith.constant 0 : index
    %c0_16 = arith.constant 0 : index
    %14 = vector.load %arg2[%c0_13, %c0_14, %c0_15, %c0_16] : memref<1x4x32x128xf32, #tpu.memory_space<vmem>>, vector<1x1x32x128xf32>
    %15 = vector.shape_cast %14 : vector<1x1x32x128xf32> to vector<32x128xf32>
    %16 = arith.subf %15, %13 : vector<32x128xf32>
    %17 = math.exp %16 : vector<32x128xf32>
    %c0_17 = arith.constant 0 : index
    %c1_18 = arith.constant 1 : index
    %c0_19 = arith.constant 0 : index
    %c0_20 = arith.constant 0 : index
    %18 = vector.load %arg2[%c0_17, %c1_18, %c0_19, %c0_20] : memref<1x4x32x128xf32, #tpu.memory_space<vmem>>, vector<1x1x32x128xf32>
    %19 = vector.shape_cast %18 : vector<1x1x32x128xf32> to vector<32x128xf32>
    %20 = arith.subf %19, %13 : vector<32x128xf32>
    %21 = math.exp %20 : vector<32x128xf32>
    %22 = arith.addf %17, %21 : vector<32x128xf32>
    %c0_21 = arith.constant 0 : index
    %c2_22 = arith.constant 2 : index
    %c0_23 = arith.constant 0 : index
    %c0_24 = arith.constant 0 : index
    %23 = vector.load %arg2[%c0_21, %c2_22, %c0_23, %c0_24] : memref<1x4x32x128xf32, #tpu.memory_space<vmem>>, vector<1x1x32x128xf32>
    %24 = vector.shape_cast %23 : vector<1x1x32x128xf32> to vector<32x128xf32>
    %25 = arith.subf %24, %13 : vector<32x128xf32>
    %26 = math.exp %25 : vector<32x128xf32>
    %27 = arith.addf %22, %26 : vector<32x128xf32>
    %c0_25 = arith.constant 0 : index
    %c3_26 = arith.constant 3 : index
    %c0_27 = arith.constant 0 : index
    %c0_28 = arith.constant 0 : index
    %28 = vector.load %arg2[%c0_25, %c3_26, %c0_27, %c0_28] : memref<1x4x32x128xf32, #tpu.memory_space<vmem>>, vector<1x1x32x128xf32>
    %29 = vector.shape_cast %28 : vector<1x1x32x128xf32> to vector<32x128xf32>
    %30 = arith.subf %29, %13 : vector<32x128xf32>
    %31 = math.exp %30 : vector<32x128xf32>
    %32 = arith.addf %27, %31 : vector<32x128xf32>
    %33 = tpu.reciprocal %32 {approx = true} : vector<32x128xf32> -> vector<32x128xf32>
    %c0_29 = arith.constant 0 : index
    %c0_30 = arith.constant 0 : index
    %c0_31 = arith.constant 0 : index
    %34 = vector.load %arg3[%c0_29, %c0_30, %c0_31] : memref<1x32x128xi8, #tpu.memory_space<vmem>>, vector<1x32x128xi8>
    %35 = vector.shape_cast %34 : vector<1x32x128xi8> to vector<32x128xi8>
    %36 = arith.extsi %35 : vector<32x128xi8> to vector<32x128xi32>
    %c0_32 = arith.constant 0 : index
    %c0_33 = arith.constant 0 : index
    %c0_34 = arith.constant 0 : index
    %c0_35 = arith.constant 0 : index
    %37 = vector.load %arg2[%c0_32, %c0_33, %c0_34, %c0_35] : memref<1x4x32x128xf32, #tpu.memory_space<vmem>>, vector<1x1x32x128xf32>
    %38 = vector.shape_cast %37 : vector<1x1x32x128xf32> to vector<32x128xf32>
    %39 = arith.subf %38, %13 : vector<32x128xf32>
    %40 = math.exp %39 : vector<32x128xf32>
    %41 = arith.mulf %40, %33 : vector<32x128xf32>
    %c0_i32_36 = arith.constant 0 : i32
    %42 = vector.broadcast %c0_i32_36 : i32 to vector<32x128xi32>
    %43 = arith.cmpi eq, %36, %42 : vector<32x128xi32>
    %44 = arith.extui %43 : vector<32x128xi1> to vector<32x128xi32>
    %45 = arith.sitofp %44 : vector<32x128xi32> to vector<32x128xf32>
    %c0_37 = arith.constant 0 : index
    %c0_38 = arith.constant 0 : index
    %46 = vector.load %arg5[%c0_37, %c0_38] : memref<4x128xf32, #tpu.memory_space<vmem>>, vector<1x128xf32>
    %47 = arith.mulf %45, %41 : vector<32x128xf32>
    %cst = arith.constant dense<0.000000e+00> : vector<128xf32>
    %48 = vector.multi_reduction <add>, %47, %cst [0] : vector<32x128xf32> to vector<128xf32>
    %49 = vector.shape_cast %48 : vector<128xf32> to vector<1x128xf32>
    %50 = arith.addf %46, %49 : vector<1x128xf32>
    %c0_39 = arith.constant 0 : index
    %c0_40 = arith.constant 0 : index
    %51 = vector.load %arg5[%c0_39, %c0_40] : memref<4x128xf32, #tpu.memory_space<vmem>>, vector<1x128xf32>
    tpu.vector_store %arg5[%c0_39, %c0_40], %50 {strides = array<i32>} : memref<4x128xf32, #tpu.memory_space<vmem>>, vector<1x128xf32>,
    %c0_41 = arith.constant 0 : index
    %c0_42 = arith.constant 0 : index
    %52 = vector.load %arg6[%c0_41, %c0_42] : memref<4x128xf32, #tpu.memory_space<vmem>>, vector<1x128xf32>
    %cst_43 = arith.constant dense<0.000000e+00> : vector<128xf32>
    %53 = vector.multi_reduction <add>, %41, %cst_43 [0] : vector<32x128xf32> to vector<128xf32>
    %54 = vector.shape_cast %53 : vector<128xf32> to vector<1x128xf32>
    %55 = arith.addf %52, %54 : vector<1x128xf32>
    %c0_44 = arith.constant 0 : index
    %c0_45 = arith.constant 0 : index
    %56 = vector.load %arg6[%c0_44, %c0_45] : memref<4x128xf32, #tpu.memory_space<vmem>>, vector<1x128xf32>
    tpu.vector_store %arg6[%c0_44, %c0_45], %55 {strides = array<i32>} : memref<4x128xf32, #tpu.memory_space<vmem>>, vector<1x128xf32>,
    %c0_46 = arith.constant 0 : index
    %c0_47 = arith.constant 0 : index
    %57 = vector.load %arg7[%c0_46, %c0_47] : memref<4x128xf32, #tpu.memory_space<vmem>>, vector<1x128xf32>
    %cst_48 = arith.constant dense<0.000000e+00> : vector<128xf32>
    %58 = vector.multi_reduction <add>, %45, %cst_48 [0] : vector<32x128xf32> to vector<128xf32>
    %59 = vector.shape_cast %58 : vector<128xf32> to vector<1x128xf32>
    %60 = arith.addf %57, %59 : vector<1x128xf32>
    %c0_49 = arith.constant 0 : index
    %c0_50 = arith.constant 0 : index
    %61 = vector.load %arg7[%c0_49, %c0_50] : memref<4x128xf32, #tpu.memory_space<vmem>>, vector<1x128xf32>
    tpu.vector_store %arg7[%c0_49, %c0_50], %60 {strides = array<i32>} : memref<4x128xf32, #tpu.memory_space<vmem>>, vector<1x128xf32>,
    %c0_51 = arith.constant 0 : index
    %c1_52 = arith.constant 1 : index
    %c0_53 = arith.constant 0 : index
    %c0_54 = arith.constant 0 : index
    %62 = vector.load %arg2[%c0_51, %c1_52, %c0_53, %c0_54] : memref<1x4x32x128xf32, #tpu.memory_space<vmem>>, vector<1x1x32x128xf32>
    %63 = vector.shape_cast %62 : vector<1x1x32x128xf32> to vector<32x128xf32>
    %64 = arith.subf %63, %13 : vector<32x128xf32>
    %65 = math.exp %64 : vector<32x128xf32>
    %66 = arith.mulf %65, %33 : vector<32x128xf32>
    %c1_i32 = arith.constant 1 : i32
    %67 = vector.broadcast %c1_i32 : i32 to vector<32x128xi32>
    %68 = arith.cmpi eq, %36, %67 : vector<32x128xi32>
    %69 = arith.extui %68 : vector<32x128xi1> to vector<32x128xi32>
    %70 = arith.sitofp %69 : vector<32x128xi32> to vector<32x128xf32>
    %c1_55 = arith.constant 1 : index
    %c0_56 = arith.constant 0 : index
    %71 = vector.load %arg5[%c1_55, %c0_56] : memref<4x128xf32, #tpu.memory_space<vmem>>, vector<1x128xf32>
    %72 = arith.mulf %70, %66 : vector<32x128xf32>
    %cst_57 = arith.constant dense<0.000000e+00> : vector<128xf32>
    %73 = vector.multi_reduction <add>, %72, %cst_57 [0] : vector<32x128xf32> to vector<128xf32>
    %74 = vector.shape_cast %73 : vector<128xf32> to vector<1x128xf32>
    %75 = arith.addf %71, %74 : vector<1x128xf32>
    %c1_58 = arith.constant 1 : index
    %c0_59 = arith.constant 0 : index
    %76 = vector.load %arg5[%c1_58, %c0_59] : memref<4x128xf32, #tpu.memory_space<vmem>>, vector<1x128xf32>
    tpu.vector_store %arg5[%c1_58, %c0_59], %75 {strides = array<i32>} : memref<4x128xf32, #tpu.memory_space<vmem>>, vector<1x128xf32>,
    %c1_60 = arith.constant 1 : index
    %c0_61 = arith.constant 0 : index
    %77 = vector.load %arg6[%c1_60, %c0_61] : memref<4x128xf32, #tpu.memory_space<vmem>>, vector<1x128xf32>
    %cst_62 = arith.constant dense<0.000000e+00> : vector<128xf32>
    %78 = vector.multi_reduction <add>, %66, %cst_62 [0] : vector<32x128xf32> to vector<128xf32>
    %79 = vector.shape_cast %78 : vector<128xf32> to vector<1x128xf32>
    %80 = arith.addf %77, %79 : vector<1x128xf32>
    %c1_63 = arith.constant 1 : index
    %c0_64 = arith.constant 0 : index
    %81 = vector.load %arg6[%c1_63, %c0_64] : memref<4x128xf32, #tpu.memory_space<vmem>>, vector<1x128xf32>
    tpu.vector_store %arg6[%c1_63, %c0_64], %80 {strides = array<i32>} : memref<4x128xf32, #tpu.memory_space<vmem>>, vector<1x128xf32>,
    %c1_65 = arith.constant 1 : index
    %c0_66 = arith.constant 0 : index
    %82 = vector.load %arg7[%c1_65, %c0_66] : memref<4x128xf32, #tpu.memory_space<vmem>>, vector<1x128xf32>
    %cst_67 = arith.constant dense<0.000000e+00> : vector<128xf32>
    %83 = vector.multi_reduction <add>, %70, %cst_67 [0] : vector<32x128xf32> to vector<128xf32>
    %84 = vector.shape_cast %83 : vector<128xf32> to vector<1x128xf32>
    %85 = arith.addf %82, %84 : vector<1x128xf32>
    %c1_68 = arith.constant 1 : index
    %c0_69 = arith.constant 0 : index
    %86 = vector.load %arg7[%c1_68, %c0_69] : memref<4x128xf32, #tpu.memory_space<vmem>>, vector<1x128xf32>
    tpu.vector_store %arg7[%c1_68, %c0_69], %85 {strides = array<i32>} : memref<4x128xf32, #tpu.memory_space<vmem>>, vector<1x128xf32>,
    %c0_70 = arith.constant 0 : index
    %c2_71 = arith.constant 2 : index
    %c0_72 = arith.constant 0 : index
    %c0_73 = arith.constant 0 : index
    %87 = vector.load %arg2[%c0_70, %c2_71, %c0_72, %c0_73] : memref<1x4x32x128xf32, #tpu.memory_space<vmem>>, vector<1x1x32x128xf32>
    %88 = vector.shape_cast %87 : vector<1x1x32x128xf32> to vector<32x128xf32>
    %89 = arith.subf %88, %13 : vector<32x128xf32>
    %90 = math.exp %89 : vector<32x128xf32>
    %91 = arith.mulf %90, %33 : vector<32x128xf32>
    %c2_i32 = arith.constant 2 : i32
    %92 = vector.broadcast %c2_i32 : i32 to vector<32x128xi32>
    %93 = arith.cmpi eq, %36, %92 : vector<32x128xi32>
    %94 = arith.extui %93 : vector<32x128xi1> to vector<32x128xi32>
    %95 = arith.sitofp %94 : vector<32x128xi32> to vector<32x128xf32>
    %c2_74 = arith.constant 2 : index
    %c0_75 = arith.constant 0 : index
    %96 = vector.load %arg5[%c2_74, %c0_75] : memref<4x128xf32, #tpu.memory_space<vmem>>, vector<1x128xf32>
    %97 = arith.mulf %95, %91 : vector<32x128xf32>
    %cst_76 = arith.constant dense<0.000000e+00> : vector<128xf32>
    %98 = vector.multi_reduction <add>, %97, %cst_76 [0] : vector<32x128xf32> to vector<128xf32>
    %99 = vector.shape_cast %98 : vector<128xf32> to vector<1x128xf32>
    %100 = arith.addf %96, %99 : vector<1x128xf32>
    %c2_77 = arith.constant 2 : index
    %c0_78 = arith.constant 0 : index
    %101 = vector.load %arg5[%c2_77, %c0_78] : memref<4x128xf32, #tpu.memory_space<vmem>>, vector<1x128xf32>
    tpu.vector_store %arg5[%c2_77, %c0_78], %100 {strides = array<i32>} : memref<4x128xf32, #tpu.memory_space<vmem>>, vector<1x128xf32>,
    %c2_79 = arith.constant 2 : index
    %c0_80 = arith.constant 0 : index
    %102 = vector.load %arg6[%c2_79, %c0_80] : memref<4x128xf32, #tpu.memory_space<vmem>>, vector<1x128xf32>
    %cst_81 = arith.constant dense<0.000000e+00> : vector<128xf32>
    %103 = vector.multi_reduction <add>, %91, %cst_81 [0] : vector<32x128xf32> to vector<128xf32>
    %104 = vector.shape_cast %103 : vector<128xf32> to vector<1x128xf32>
    %105 = arith.addf %102, %104 : vector<1x128xf32>
    %c2_82 = arith.constant 2 : index
    %c0_83 = arith.constant 0 : index
    %106 = vector.load %arg6[%c2_82, %c0_83] : memref<4x128xf32, #tpu.memory_space<vmem>>, vector<1x128xf32>
    tpu.vector_store %arg6[%c2_82, %c0_83], %105 {strides = array<i32>} : memref<4x128xf32, #tpu.memory_space<vmem>>, vector<1x128xf32>,
    %c2_84 = arith.constant 2 : index
    %c0_85 = arith.constant 0 : index
    %107 = vector.load %arg7[%c2_84, %c0_85] : memref<4x128xf32, #tpu.memory_space<vmem>>, vector<1x128xf32>
    %cst_86 = arith.constant dense<0.000000e+00> : vector<128xf32>
    %108 = vector.multi_reduction <add>, %95, %cst_86 [0] : vector<32x128xf32> to vector<128xf32>
    %109 = vector.shape_cast %108 : vector<128xf32> to vector<1x128xf32>
    %110 = arith.addf %107, %109 : vector<1x128xf32>
    %c2_87 = arith.constant 2 : index
    %c0_88 = arith.constant 0 : index
    %111 = vector.load %arg7[%c2_87, %c0_88] : memref<4x128xf32, #tpu.memory_space<vmem>>, vector<1x128xf32>
    tpu.vector_store %arg7[%c2_87, %c0_88], %110 {strides = array<i32>} : memref<4x128xf32, #tpu.memory_space<vmem>>, vector<1x128xf32>,
    %c0_89 = arith.constant 0 : index
    %c3_90 = arith.constant 3 : index
    %c0_91 = arith.constant 0 : index
    %c0_92 = arith.constant 0 : index
    %112 = vector.load %arg2[%c0_89, %c3_90, %c0_91, %c0_92] : memref<1x4x32x128xf32, #tpu.memory_space<vmem>>, vector<1x1x32x128xf32>
    %113 = vector.shape_cast %112 : vector<1x1x32x128xf32> to vector<32x128xf32>
    %114 = arith.subf %113, %13 : vector<32x128xf32>
    %115 = math.exp %114 : vector<32x128xf32>
    %116 = arith.mulf %115, %33 : vector<32x128xf32>
    %c3_i32 = arith.constant 3 : i32
    %117 = vector.broadcast %c3_i32 : i32 to vector<32x128xi32>
    %118 = arith.cmpi eq, %36, %117 : vector<32x128xi32>
    %119 = arith.extui %118 : vector<32x128xi1> to vector<32x128xi32>
    %120 = arith.sitofp %119 : vector<32x128xi32> to vector<32x128xf32>
    %c3_93 = arith.constant 3 : index
    %c0_94 = arith.constant 0 : index
    %121 = vector.load %arg5[%c3_93, %c0_94] : memref<4x128xf32, #tpu.memory_space<vmem>>, vector<1x128xf32>
    %122 = arith.mulf %120, %116 : vector<32x128xf32>
    %cst_95 = arith.constant dense<0.000000e+00> : vector<128xf32>
    %123 = vector.multi_reduction <add>, %122, %cst_95 [0] : vector<32x128xf32> to vector<128xf32>
    %124 = vector.shape_cast %123 : vector<128xf32> to vector<1x128xf32>
    %125 = arith.addf %121, %124 : vector<1x128xf32>
    %c3_96 = arith.constant 3 : index
    %c0_97 = arith.constant 0 : index
    %126 = vector.load %arg5[%c3_96, %c0_97] : memref<4x128xf32, #tpu.memory_space<vmem>>, vector<1x128xf32>
    tpu.vector_store %arg5[%c3_96, %c0_97], %125 {strides = array<i32>} : memref<4x128xf32, #tpu.memory_space<vmem>>, vector<1x128xf32>,
    %c3_98 = arith.constant 3 : index
    %c0_99 = arith.constant 0 : index
    %127 = vector.load %arg6[%c3_98, %c0_99] : memref<4x128xf32, #tpu.memory_space<vmem>>, vector<1x128xf32>
    %cst_100 = arith.constant dense<0.000000e+00> : vector<128xf32>
    %128 = vector.multi_reduction <add>, %116, %cst_100 [0] : vector<32x128xf32> to vector<128xf32>
    %129 = vector.shape_cast %128 : vector<128xf32> to vector<1x128xf32>
    %130 = arith.addf %127, %129 : vector<1x128xf32>
    %c3_101 = arith.constant 3 : index
    %c0_102 = arith.constant 0 : index
    %131 = vector.load %arg6[%c3_101, %c0_102] : memref<4x128xf32, #tpu.memory_space<vmem>>, vector<1x128xf32>
    tpu.vector_store %arg6[%c3_101, %c0_102], %130 {strides = array<i32>} : memref<4x128xf32, #tpu.memory_space<vmem>>, vector<1x128xf32>,
    %c3_103 = arith.constant 3 : index
    %c0_104 = arith.constant 0 : index
    %132 = vector.load %arg7[%c3_103, %c0_104] : memref<4x128xf32, #tpu.memory_space<vmem>>, vector<1x128xf32>
    %cst_105 = arith.constant dense<0.000000e+00> : vector<128xf32>
    %133 = vector.multi_reduction <add>, %120, %cst_105 [0] : vector<32x128xf32> to vector<128xf32>
    %134 = vector.shape_cast %133 : vector<128xf32> to vector<1x128xf32>
    %135 = arith.addf %132, %134 : vector<1x128xf32>
    %c3_106 = arith.constant 3 : index
    %c0_107 = arith.constant 0 : index
    %136 = vector.load %arg7[%c3_106, %c0_107] : memref<4x128xf32, #tpu.memory_space<vmem>>, vector<1x128xf32>
    tpu.vector_store %arg7[%c3_106, %c0_107], %135 {strides = array<i32>} : memref<4x128xf32, #tpu.memory_space<vmem>>, vector<1x128xf32>,
    %c0_i32_108 = arith.constant 0 : i32
    %137 = arith.cmpi eq, %arg1, %c0_i32_108 : i32
    %138 = arith.extui %137 : i1 to i32
    %c0_i32_109 = arith.constant 0 : i32
    %139 = arith.cmpi ne, %138, %c0_i32_109 : i32
    scf.if %139 {
      %c0_110 = arith.constant 0 : index
      %c0_111 = arith.constant 0 : index
      %140 = vector.load %arg5[%c0_110, %c0_111] : memref<4x128xf32, #tpu.memory_space<vmem>>, vector<4x128xf32>
      %cst_112 = arith.constant dense<0.000000e+00> : vector<4xf32>
      %141 = vector.multi_reduction <add>, %140, %cst_112 [1] : vector<4x128xf32> to vector<4xf32>
      %142 = vector.shape_cast %141 : vector<4xf32> to vector<4x1xf32>
      %c0_113 = arith.constant 0 : index
      %c0_114 = arith.constant 0 : index
      %143 = vector.load %arg6[%c0_113, %c0_114] : memref<4x128xf32, #tpu.memory_space<vmem>>, vector<4x128xf32>
      %cst_115 = arith.constant dense<0.000000e+00> : vector<4xf32>
      %144 = vector.multi_reduction <add>, %143, %cst_115 [1] : vector<4x128xf32> to vector<4xf32>
      %145 = vector.shape_cast %144 : vector<4xf32> to vector<4x1xf32>
      %c0_116 = arith.constant 0 : index
      %c0_117 = arith.constant 0 : index
      %146 = vector.load %arg7[%c0_116, %c0_117] : memref<4x128xf32, #tpu.memory_space<vmem>>, vector<4x128xf32>
      %cst_118 = arith.constant dense<0.000000e+00> : vector<4xf32>
      %147 = vector.multi_reduction <add>, %146, %cst_118 [1] : vector<4x128xf32> to vector<4xf32>
      %148 = vector.shape_cast %147 : vector<4xf32> to vector<4x1xf32>
      %cst_119 = arith.constant 4.000000e+00 : f32
      %149 = vector.broadcast %cst_119 : f32 to vector<1x1xf32>
      %150 = tpu.reciprocal %149 {approx = true} : vector<1x1xf32> -> vector<1x1xf32>
      %cst_120 = arith.constant 3.840000e+03 : f32
      %151 = vector.broadcast %cst_120 : f32 to vector<1x1xf32>
      %152 = arith.mulf %151, %150 : vector<1x1xf32>
      %153 = vector.broadcast %152 : vector<1x1xf32> to vector<4x1xf32>
      %154 = arith.subf %145, %153 : vector<4x1xf32>
      %cst_121 = arith.constant 2.000000e+00 : f32
      %155 = vector.broadcast %cst_121 : f32 to vector<4x1xf32>
      %156 = arith.mulf %155, %142 : vector<4x1xf32>
      %cst_122 = arith.constant 1.000000e+00 : f32
      %157 = vector.broadcast %cst_122 : f32 to vector<4x1xf32>
      %158 = arith.addf %156, %157 : vector<4x1xf32>
      %159 = arith.addf %154, %148 : vector<4x1xf32>
      %cst_123 = arith.constant 1.000000e+00 : f32
      %160 = vector.broadcast %cst_123 : f32 to vector<4x1xf32>
      %161 = arith.addf %159, %160 : vector<4x1xf32>
      %162 = arith.divf %158, %161 : vector<4x1xf32>
      %cst_124 = arith.constant dense<0.000000e+00> : vector<1xf32>
      %163 = vector.multi_reduction <add>, %162, %cst_124 [0] : vector<4x1xf32> to vector<1xf32>
      %164 = vector.shape_cast %163 : vector<1xf32> to vector<1x1xf32>
      %c0_125 = arith.constant 0 : index
      %c0_126 = arith.constant 0 : index
      %c0_127 = arith.constant 0 : index
      %165 = vector.load %arg4[%c0_125, %c0_126, %c0_127] : memref<1x1x1xf32, #tpu.memory_space<vmem>>, vector<1x1x1xf32>
      %166 = vector.shape_cast %165 : vector<1x1x1xf32> to vector<1x1xf32>
      %167 = vector.shape_cast %164 : vector<1x1xf32> to vector<1x1x1xf32>
      tpu.vector_store %arg4[%c0_125, %c0_126, %c0_127], %167 {strides = array<i32>} : memref<1x1x1xf32, #tpu.memory_space<vmem>>, vector<1x1x1xf32>,
    } else {
    }
    return
  }
  func.func @transform_0(%arg0: i32, %arg1: i32) -> (i32, i32, i32, i32) {
    %c0_i32 = arith.constant 0 : i32
    %c0_i32_0 = arith.constant 0 : i32
    %c0_i32_1 = arith.constant 0 : i32
    return %arg0, %c0_i32, %arg1, %c0_i32_0 : i32, i32, i32, i32
  }
  func.func @transform_1(%arg0: i32, %arg1: i32) -> (i32, i32, i32) {
    %c0_i32 = arith.constant 0 : i32
    %c0_i32_0 = arith.constant 0 : i32
    return %arg0, %arg1, %c0_i32 : i32, i32, i32
  }
  func.func @transform_2(%arg0: i32, %arg1: i32) -> (i32, i32, i32) {
    %c0_i32 = arith.constant 0 : i32
    %c0_i32_0 = arith.constant 0 : i32
    %c0_i32_1 = arith.constant 0 : i32
    return %arg0, %c0_i32, %c0_i32_0 : i32, i32, i32
  }
}

</mosaic_0001>

<bundles_post_ra>
// kernel: tpu_custom_call.1
= control target key start
LH: loop header
LB: loop body
LE: loop exit
PB: predicated region body
PF: predicated region fallthrough
CT: control target
= control target key end

     0   :  { %7 = vsyncpa [#allocation6], 0  ;;  %s1383_s0 = inlined_call_operand.hbm [shape: f32[2,4,32,128], index: 0, kind: input, shape index: {}]   ;;  %s1384_s1 = inlined_call_operand.hbm [shape: s8[2,32,128], index: 1, kind: input, shape index: {}]   ;;  %s1385_s2 = inlined_call_operand.vmem [shape: f32[2,1,1], index: 2, kind: output, shape index: {}]  }
   0x1   :  { %9 = vsyncpa [#allocation6 + $0x1], 0 }
   0x2   :  { %10 = vsyncpa [#allocation8], 0 }
   0x3   :  { %12 = vsyncpa [#allocation8 + $0x1], 0  ;;  %s1021_s9 = smov 0   ;;  %s1023_s10 = smov 0  }
   0x4   :  { %s1025_s11 = smov 0   ;;  %s1027_s12 = smov 0  }
   0x5   :  { %s1029_s13 = smov 0   ;;  %s1031_s14 = smov 0  }
   0x6 LB: > { %s724_s15 = sadd.s32 4294967295, %s999_s14   ;;  %s30_s16 = sadd.s32 1, %s995_s13  ;;  %s999_s14 = sphi %s1031_s14, %s18_s14   ;;  %s995_s13 = sphi %s1029_s13, %s1397_s13   ;;  %s991_s12 = sphi %s1027_s12, %s1396_s12   ;;  %s987_s11 = sphi %s1025_s11, %s1395_s11   ;;  %s983_s10 = sphi %s1023_s10, %s1394_s10   ;;  %s979_s9 = sphi %s1021_s9, %s1393_s9  }
   0x7   : > { %p32_p0 = scmp.ge.s32.totalorder %s30_s16, 2  ;;  %s39_s17 = sadd.s32 1, %s987_s11 }
   0x8   : > { %p46_p1 = scmp.ne.s32.totalorder %s987_s11, %s983_s10  ;;  %p47_p2 = scmp.eq.s32.totalorder %s999_s14, 0 }
   0x9   : > { %s1399_s16 = smov (%p32_p0, %s30_s16), 0  ;;  %p52_p4 = scmp.ne.s32.totalorder %s983_s10, %s979_s9 }
   0xa   : > { %p1057_p3 = por %p47_p2, %p46_p1  ;;  %s34_s19 = ssub.s32 %s995_s13, %s1399_s16 }
   0xb   : > { %p53_p5 = scmp.eq.s32.totalorder %s724_s15, 0  ;;  %p37_p6 = scmp.eq.s32.totalorder %s34_s19, 0 }
   0xc   : > { %p791_p8 = scmp.lt.s32.totalorder %s999_s14, 2  ;;  %s1073_s22 = sand.u32 1, %s987_s11  }
   0xd   : > { %p1064_p7 = por %p53_p5, %p52_p4  ;;  %s779_s23 = sshll.u32 %s995_s13, 11 }
   0xe   : > { %s1070_s21 = scalar_select %p37_p6, %s987_s11, %s39_s17  }
   0xf   : > { %s1388_s20 = scalar_select %p1064_p7, 1, 0 }
  0x10   : > { %s728_s24 = sshll.u32 %s1073_s22, 7  ;;  %s1080_s27 = scalar_lea.hbm %s1383_s0, %s779_s23 }
  0x11   : > { %s134_s28 = scalar_lea.vmem [#allocation5], %s728_s24  ;;  %p1084_p9 = pnand %p791_p8, %p1057_p3 }
  0x12   : > { %s143_s29 = sshll.u32 %s134_s28, 4  ;;  %s131_s3 = scalar_lea.sflag [#allocation6], %s1073_s22  ;;  %s1088_s29 = int_to_ptr.vmem [resolvable:$true] %s143_s29 }
  0x13   : > { %s885_s4 = scalar_lea.hbm %s1080_s27, 2048  ;;  %p887_p11 = pneg %p1084_p9 }
  0x14   : > { %p886_p10 = scmp.ne.s32.totalorder %s1080_s27, %s885_s4  ;;  %s890_s7 = scalar_lea.hbm %s1383_s0, 4096 }
  0x15   : > { %p891_p0 = scmp.lt.u32.totalorder %s1080_s27, %s1383_s0  ;;  %p892_p1 = scmp.lt.u32.totalorder %s890_s7, %s885_s4 }
  0x16   : > { %p888_p12 = pnand %p887_p11, %p886_p10  ;;  %p894_p3 = scmp.lt.u32.totalorder %s885_s4, %s1080_s27 }
  0x17   : > { %p893_p2 = por %p892_p1, %p891_p0 }
  0x18   : > { %p889_p13 = pneg %p888_p12 }
  0x19   : > { %p895_p4 = por %p894_p3, %p893_p2 }
  0x1b   : > { %p896_p5 = pnand %p895_p4, %p889_p13 }
  0x1d   : > { %899 = shalt.err (!%p896_p5)
}
  0x1e   : > { %s900_s15 = scalar_lea.vmem %s1088_s29, 2048  ;;  %s1001_s17 = smov [#allocation5]  }
  0x1f   : > { %p901_p6 = scmp.ne.s32.totalorder %s1088_s29, %s900_s15  ;;  %s905_s18 = sshll.u32 %s1001_s17, 4  ;;  %s906_s18 = int_to_ptr.vmem [resolvable:$false] %s905_s18 }
  0x20   : > { %s907_s19 = scalar_lea.vmem %s906_s18, 4096  ;;  %p908_p12 = scmp.lt.s32.totalorder %s1088_s29, %s906_s18 }
  0x21   : > { %p903_p8 = pnand %p901_p6, %p887_p11  ;;  %p909_p0 = scmp.lt.s32.totalorder %s907_s19, %s900_s15 }
  0x23   : > { %p904_p10 = pneg %p903_p8  ;;  %p910_p1 = por %p909_p0, %p908_p12 }
  0x25   : > { %p911_p2 = pnand %p910_p1, %p904_p10 }
  0x27   : > { %914 = shalt.err (!%p911_p2)
}
  0x28   : > { %s1002_s23 = smov 128   ;;  %s1003_s24 = smov 8  }
  0x29   : > { %787 = dma.hbm_to_vmem [thread:$0]  (!%p1084_p9), %s1080_s27, 2048, %s1088_s29, %s131_s3, %s1002_s23, %s1002_s23, %s1003_s24  }
  0x2a   : > { %p733_p13 = scmp.ge.s32.totalorder %s999_s14, 1  ;;  %p170_p3 = scmp.lt.s32.totalorder %s999_s14, 3 }
  0x2b   : > { %s731_s25 = sshll.u32 %s1073_s22, 3  ;;  %s732_s28 = sshll.u32 %s995_s13, 7 }
  0x2c   : > { %p1121_p4 = pnand %p733_p13, %p170_p3  ;;  %s157_s4 = scalar_lea.vmem [#allocation7], %s731_s25 }
  0x2d   : > { %s165_s5 = sshll.u32 %s157_s4, 4  ;;  %s1129_s8 = scalar_lea.hbm %s1384_s1, %s732_s28  ;;  %s166_s5 = int_to_ptr.vmem [resolvable:$true] %s165_s5 }
  0x2e   : > { %s1390_s26 = scalar_select %p1121_p4, 1, 0 }
  0x2f   : > { %s154_s27 = scalar_lea.sflag [#allocation8], %s1073_s22  ;;  %s915_s29 = scalar_lea.hbm %s1129_s8, 128 }
  0x30   : > { %p916_p5 = scmp.ne.s32.totalorder %s1129_s8, %s915_s29  ;;  %s920_s15 = scalar_lea.hbm %s1384_s1, 256 }
  0x31   : > { %p921_p10 = scmp.lt.u32.totalorder %s1129_s8, %s1384_s1  ;;  %p922_p12 = scmp.lt.u32.totalorder %s920_s15, %s915_s29 }
  0x32   : > { %p918_p6 = pnand %p916_p5, %p887_p11  ;;  %p924_p1 = scmp.lt.u32.totalorder %s915_s29, %s1129_s8 }
  0x33   : > { %p923_p0 = por %p922_p12, %p921_p10 }
  0x34   : > { %p919_p8 = pneg %p918_p6 }
  0x35   : > { %p925_p2 = por %p924_p1, %p923_p0 }
  0x37   : > { %p926_p13 = pnand %p925_p2, %p919_p8 }
  0x39   : > { %929 = shalt.err (!%p926_p13)
}
  0x3a   : > { %s930_s22 = scalar_lea.vmem %s166_s5, 128  ;;  %s1004_s19 = smov [#allocation7]  }
  0x3b   : > { %p931_p3 = scmp.ne.s32.totalorder %s166_s5, %s930_s22  ;;  %s935_s23 = sshll.u32 %s1004_s19, 4  ;;  %s936_s23 = int_to_ptr.vmem [resolvable:$false] %s935_s23 }
  0x3c   : > { %s937_s24 = scalar_lea.vmem %s936_s23, 256  ;;  %p938_p7 = scmp.lt.s32.totalorder %s166_s5, %s936_s23 }
  0x3d   : > { %p933_p5 = pnand %p931_p3, %p887_p11  ;;  %p939_p4 = scmp.lt.s32.totalorder %s937_s24, %s930_s22 }
  0x3f   : > { %p934_p6 = pneg %p933_p5  ;;  %p940_p10 = por %p939_p4, %p938_p7 }
  0x41   : > { %p941_p12 = pnand %p940_p10, %p934_p6 }
  0x43   : > { %944 = shalt.err (!%p941_p12)
}
  0x44   : > { %790 = dma.hbm_to_vmem [thread:$0]  (!%p1084_p9), %s1129_s8, 128, %s166_s5, %s154_s27  }
  0x45   : > { %p1391_p8 = scmp.ne.s32.totalorder %s1390_s26, 0 }
  0x46   : > { %s176_s25 = sand.u32 (!%p1391_p8), 1, %s983_s10   ;;  %p1392_p11 = scmp.ne.s32.totalorder (!%p1391_p8), %s1388_s20, 0 }
  0x47   : > { %174 = sbr.rel (%p1391_p8) target bundleno = 345 (0x159), region = 28  ;;  %s734_s28 = sshll.u32 (!%p1391_p8), %s176_s25, 7 }
  0x48   : > { %s177_s4 = scalar_lea.sflag (!%p1391_p8), [#allocation6], %s176_s25  ;;  %s1154_s6 = scalar_lea.vmem (!%p1391_p8), [#allocation5], %s734_s28 }
  0x4e   : > { %970 = dma.done.wait (%p1392_p11), %s177_s4, 2048  }
  0x4f   : > { %972 = vsyncadd (%p1392_p11), %s177_s4, 4294965248  ;;  %s735_s7 = sshll.u32 %s176_s25, 3  ;;  %s186_s30 = scalar_lea.sflag [#allocation8], %s176_s25 }
  0x50   : > { %s1160_s29 = scalar_lea.vmem [#allocation7], %s735_s7 }
  0x51   : > { %974 = dma.done.wait (%p1392_p11), %s186_s30, 128  }
  0x52   : > { %976 = vsyncadd (%p1392_p11), %s186_s30, 4294967168  ;;  %v1005_v0 = vmov 0.0   ;;  %v224_v1 = vld [vmem:[%s1154_s6] sm:$0xff]  ;;  %v225_v2 = vld [vmem:[%s1154_s6 + $0x8] sm:$0xff]  ;;  %p214_p7 = scmp.lt.s32.totalorder %s991_s12, 1 }
  0x53   : > { %222 = vst [vmem:[#allocation3] sm:$0xf] %v1005_v0  ;;  %221 = vst [vmem:[#allocation2] sm:$0xf] %v1005_v0  ;;  %v226_v3 = vld [vmem:[%s1154_s6 + $0x10] sm:$0xff]  ;;  %v227_v4 = vld [vmem:[%s1154_s6 + $0x18] sm:$0xff] }
  0x54   : > { %223 = vst [vmem:[#allocation4] sm:$0xf] %v1005_v0  ;;  %v736_v5 = vld [vmem:[%s1154_s6 + $0x20] sm:$0xff]  ;;  %v737_v6 = vld [vmem:[%s1154_s6 + $0x28] sm:$0xff]  ;;  %v738_v7 = vld [vmem:[%s1154_s6 + $0x30] sm:$0xff]  ;;  %s1401_s12 = smov (!%p214_p7, %s991_s12), 1 }
  0x55   : > { %v739_v8 = vld [vmem:[%s1154_s6 + $0x38] sm:$0xff]  ;;  %v233_v9 = vmax.f32 %v224_v1, %v736_v5  ;;  %v234_v10 = vmax.f32 %v225_v2, %v737_v6  ;;  %v740_v11 = vld [vmem:[%s1154_s6 + $0x40] sm:$0xff]  ;;  %v235_v12 = vmax.f32 %v226_v3, %v738_v7  ;;  %v741_v14 = vld [vmem:[%s1154_s6 + $0x48] sm:$0xff]  ;;  %s216_s5 = scalar_lea.vmem %s1385_s2, %s1401_s12 }
  0x56   : > { %v236_v13 = vmax.f32 %v227_v4, %v739_v8  ;;  %v742_v15 = vld [vmem:[%s1154_s6 + $0x50] sm:$0xff]  ;;  %v743_v16 = vld [vmem:[%s1154_s6 + $0x58] sm:$0xff]  ;;  %v744_v19 = vld [vmem:[%s1154_s6 + $0x60] sm:$0xff] }
  0x57   : > { %v242_v17 = vmax.f32 %v233_v9, %v740_v11  ;;  %v243_v18 = vmax.f32 %v234_v10, %v741_v14  ;;  %v745_v20 = vld [vmem:[%s1154_s6 + $0x68] sm:$0xff]  ;;  %v746_v21 = vld [vmem:[%s1154_s6 + $0x70] sm:$0xff]  ;;  %v244_v22 = vmax.f32 %v235_v12, %v742_v15  ;;  %v747_v24 = vld [vmem:[%s1154_s6 + $0x78] sm:$0xff] }
  0x58   : > { %v245_v23 = vmax.f32 %v236_v13, %v743_v16  ;;  %v319_v27 = vld [vmem:[%s1160_s29] sm:$0xff] }
  0x59   : > { %v251_v25 = vmax.f32 %v242_v17, %v744_v19  ;;  %v252_v26 = vmax.f32 %v243_v18, %v745_v20  ;;  %v253_v28 = vmax.f32 %v244_v22, %v746_v21  ;;  %v1186_v30 = vunpack.c.0.s8 %v319_v27 }
  0x5a   : > { %v254_v29 = vmax.f32 %v245_v23, %v747_v24  ;;  %v1188_v31 = vunpack.c.1.s8 %v319_v27  ;;  %v1190_v62 = vunpack.c.2.s8 %v319_v27 }
  0x5b   : > { %v255_v32 = vsub.f32 %v224_v1, %v251_v25  ;;  %v256_v33 = vsub.f32 %v225_v2, %v252_v26  ;;  %v267_v34 = vsub.f32 %v736_v5, %v251_v25  ;;  %v268_v35 = vsub.f32 %v737_v6, %v252_v26 }
  0x5c   : > { %v257_v36 = vsub.f32 %v226_v3, %v253_v28  ;;  %v258_v37 = vsub.f32 %v227_v4, %v254_v29  ;;  %v269_v38 = vsub.f32 %v738_v7, %v253_v28  ;;  %v270_v39 = vsub.f32 %v739_v8, %v254_v29 }
  0x5d   : > { %v259_v40 = vmul.f32 1.442695, %v255_v32  ;;  %v261_v41 = vmul.f32 1.442695, %v256_v33  ;;  %v271_v42 = vmul.f32 1.442695, %v267_v34  ;;  %v283_v43 = vsub.f32 %v740_v11, %v251_v25 }
  0x5e   : > { %v263_v44 = vmul.f32 1.442695, %v257_v36  ;;  %v265_v45 = vmul.f32 1.442695, %v258_v37  ;;  %v273_v46 = vmul.f32 1.442695, %v268_v35  ;;  %v284_v47 = vsub.f32 %v741_v14, %v252_v26 }
  0x5f   : > { %843 = vpow2.f32 %v259_v40  ;;  %v275_v48 = vmul.f32 1.442695, %v269_v38  ;;  %v277_v49 = vmul.f32 1.442695, %v270_v39  ;;  %v285_v50 = vsub.f32 %v742_v15, %v253_v28 }
  0x60   : > { %845 = vpow2.f32 %v261_v41  ;;  %v286_v51 = vsub.f32 %v743_v16, %v254_v29  ;;  %v287_v52 = vmul.f32 1.442695, %v283_v43  ;;  %v289_v53 = vmul.f32 1.442695, %v284_v47 }
  0x61   : > { %847 = vpow2.f32 %v263_v44  ;;  %v291_v54 = vmul.f32 1.442695, %v285_v50  ;;  %v299_v55 = vsub.f32 %v744_v19, %v251_v25  ;;  %v300_v56 = vsub.f32 %v745_v20, %v252_v26 }
  0x62   : > { %849 = vpow2.f32 %v265_v45  ;;  %v293_v57 = vmul.f32 1.442695, %v286_v51  ;;  %v301_v58 = vsub.f32 %v746_v21, %v253_v28  ;;  %v302_v59 = vsub.f32 %v747_v24, %v254_v29 }
  0x63   : > { %851 = vpow2.f32 %v271_v42  ;;  %v303_v60 = vmul.f32 1.442695, %v299_v55  ;;  %v305_v61 = vmul.f32 1.442695, %v300_v56  ;;  %v1192_v2 = vunpack.c.3.s8 %v319_v27 }
  0x64   : > { %853 = vpow2.f32 %v273_v46  ;;  %v307_v63 = vmul.f32 1.442695, %v301_v58  ;;  %v309_v1 = vmul.f32 1.442695, %v302_v59  ;;  %vm328_vm0 = vcmp.eq.s32.totalorder %v1186_v30, 0 }
  0x65   : > { %855 = vpow2.f32 %v275_v48  ;;  %vm329_vm1 = vcmp.eq.s32.totalorder %v1188_v31, 0  ;;  %vm330_vm2 = vcmp.eq.s32.totalorder %v1190_v62, 0  ;;  %vm331_vm3 = vcmp.eq.s32.totalorder %v1192_v2, 0  ;;  %v368_v59 = vld [vmem:[#allocation4] sm:$0x1] }
  0x66   : > { %857 = vpow2.f32 %v277_v49  ;;  %v1199_v3 = vsel %vm328_vm0, 1.0, %v1005_v0  ;;  %v1202_v4 = vsel %vm329_vm1, 1.0, %v1005_v0  ;;  %v1205_v5 = vsel %vm330_vm2, 1.0, %v1005_v0 }
  0x67   : > { %859 = vpow2.f32 %v287_v52  ;;  %v1208_v6 = vsel %vm331_vm3, 1.0, %v1005_v0  ;;  %v369_v7 = vadd.f32 %v1202_v4, %v1199_v3  ;;  %vm400_vm4 = vcmp.eq.s32.totalorder %v1186_v30, 1 }
  0x68   : > { %861 = vpow2.f32 %v289_v53  ;;  %vm401_vm5 = vcmp.eq.s32.totalorder %v1188_v31, 1  ;;  %vm402_vm6 = vcmp.eq.s32.totalorder %v1190_v62, 1  ;;  %vm403_vm7 = vcmp.eq.s32.totalorder %v1192_v2, 1 }
  0x69   : > { %v1215_v8 = vpop.eup %843  ;;  %863 = vpow2.f32 %v291_v54  ;;  %v370_v9 = vadd.f32 %v1205_v5, %v369_v7  ;;  %v1220_v10 = vsel %vm400_vm4, 1.0, %v1005_v0  ;;  %v1225_v12 = vsel %vm401_vm5, 1.0, %v1005_v0 }
  0x6a   : > { %v1222_v11 = vpop.eup %845  ;;  %865 = vpow2.f32 %v293_v57  ;;  %v1228_v13 = vsel %vm402_vm6, 1.0, %v1005_v0  ;;  %v1231_v14 = vsel %vm403_vm7, 1.0, %v1005_v0  ;;  %v441_v17 = vadd.f32 %v1225_v12, %v1220_v10 }
  0x6b   : > { %v1233_v15 = vpop.eup %847  ;;  %867 = vpow2.f32 %v303_v60  ;;  %v371_v16 = vadd.f32 %v1208_v6, %v370_v9  ;;  %vm472_vm8 = vcmp.eq.s32.totalorder %v1186_v30, 2  ;;  %vm473_vm9 = vcmp.eq.s32.totalorder %v1188_v31, 2 }
  0x6c   : > { %v1239_v18 = vpop.eup %849  ;;  %869 = vpow2.f32 %v305_v61  ;;  %vm474_vm10 = vcmp.eq.s32.totalorder %v1190_v62, 2  ;;  %vm475_vm11 = vcmp.eq.s32.totalorder %v1192_v2, 2  ;;  %v442_v21 = vadd.f32 %v1228_v13, %v441_v17 }
  0x6d   : > { %v1244_v19 = vpop.eup %851  ;;  %871 = vpow2.f32 %v307_v63  ;;  %v372_v20 = vrot.slane %v371_v16, 4  ;;  %v1248_v22 = vsel %vm472_vm8, 1.0, %v1005_v0  ;;  %v1255_v25 = vsel %vm473_vm9, 1.0, %v1005_v0 }
  0x6e   : > { %v1250_v23 = vpop.eup %853  ;;  %v279_v24 = vadd.f32 %v1244_v19, %v1215_v8  ;;  %873 = vpow2.f32 %v309_v1  ;;  %v1258_v26 = vsel %vm474_vm10, 1.0, %v1005_v0  ;;  %v443_v32 = vadd.f32 %v1231_v14, %v442_v21 }
  0x6f   : > { %v1260_v27 = vpop.eup %855  ;;  %v280_v28 = vadd.f32 %v1250_v23, %v1222_v11  ;;  %v373_v29 = vadd.f32 %v372_v20, %v371_v16  ;;  %v1266_v33 = vsel %vm475_vm11, 1.0, %v1005_v0  ;;  %v513_v36 = vadd.f32 %v1255_v25, %v1248_v22 }
  0x70   : > { %v1268_v34 = vpop.eup %857  ;;  %v281_v35 = vadd.f32 %v1260_v27, %v1233_v15  ;;  %vm544_vm12 = vcmp.eq.s32.totalorder %v1186_v30, 3  ;;  %vm545_vm13 = vcmp.eq.s32.totalorder %v1188_v31, 3  ;;  %v444_v40 = vrot.slane %v443_v32, 4 }
  0x71   : > { %v1276_v37 = vpop.eup %859  ;;  %v282_v38 = vadd.f32 %v1268_v34, %v1239_v18  ;;  %v374_v39 = vrot.slane %v373_v29, 2  ;;  %vm546_vm14 = vcmp.eq.s32.totalorder %v1190_v62, 3  ;;  %v514_v43 = vadd.f32 %v1258_v26, %v513_v36 }
  0x72   : > { %v1281_v41 = vpop.eup %861  ;;  %v295_v42 = vadd.f32 %v1276_v37, %v279_v24  ;;  %vm547_vm15 = vcmp.eq.s32.totalorder %v1192_v2, 3  ;;  %v1287_v30 = vsel %vm544_vm12, 1.0, %v1005_v0  ;;  %v445_v46 = vadd.f32 %v444_v40, %v443_v32 }
  0x73   : > { %v1289_v31 = vpop.eup %863  ;;  %v296_v44 = vadd.f32 %v1281_v41, %v280_v28  ;;  %v375_v45 = vadd.f32 %v374_v39, %v373_v29  ;;  %v1293_v47 = vsel %vm545_vm13, 1.0, %v1005_v0  ;;  %v515_v50 = vadd.f32 %v1266_v33, %v514_v43  ;;  %v440_v29 = vld [vmem:[#allocation4 + $0x1] sm:$0x1] }
  0x74   : > { %v1295_v48 = vpop.eup %865  ;;  %v297_v49 = vadd.f32 %v1289_v31, %v281_v35  ;;  %v1300_v51 = vsel %vm546_vm14, 1.0, %v1005_v0  ;;  %v446_v55 = vrot.slane %v445_v46, 2  ;;  %v585_v56 = vadd.f32 %v1293_v47, %v1287_v30 }
  0x75   : > { %v868_v52 = vpop.eup %867  ;;  %v298_v53 = vadd.f32 %v1295_v48, %v282_v38  ;;  %v376_v54 = vrot.slane %v375_v45, 1  ;;  %v516_v60 = vrot.slane %v515_v50, 4  ;;  %v1308_v61 = vsel %vm547_vm15, 1.0, %v1005_v0 }
  0x76   : > { %v870_v57 = vpop.eup %869  ;;  %v311_v58 = vadd.f32 %v868_v52, %v295_v42  ;;  %v447_v7 = vadd.f32 %v446_v55, %v445_v46  ;;  %v586_v9 = vadd.f32 %v1300_v51, %v585_v56  ;;  %v512_v42 = vld [vmem:[#allocation4 + $0x2] sm:$0x1]  ;;  %vm600_vm0 = vcmask 1043456  }
  0x77   : > { %v872_v62 = vpop.eup %871  ;;  %v312_v63 = vadd.f32 %v870_v57, %v296_v44  ;;  %v377_v1 = vadd.f32 %v376_v54, %v375_v45  ;;  %v517_v20 = vadd.f32 %v516_v60, %v515_v50  ;;  %vm628_vm1 = vcmask 0  }
  0x78   : > { %v874_v16 = vpop.eup %873  ;;  %v313_v17 = vadd.f32 %v872_v62, %v297_v49  ;;  %875 = vrcp.f32 %v311_v58  ;;  %v448_v28 = vrot.slane %v447_v7, 1  ;;  %v587_v0 = vadd.f32 %v1308_v61, %v586_v9 }
  0x79   : > { %v314_v21 = vadd.f32 %v874_v16, %v298_v53  ;;  %877 = vrcp.f32 %v312_v63  ;;  %v378_v24 = vadd.f32 %v377_v1, %v368_v59  ;;  %v518_v32 = vrot.slane %v517_v20, 2 }
  0x7a   : > { %879 = vrcp.f32 %v313_v17  ;;  %v449_v2 = vadd.f32 %v448_v28, %v447_v7  ;;  %v588_v36 = vrot.slane %v587_v0, 4  ;;  %v584_v28 = vld [vmem:[#allocation4 + $0x3] sm:$0x1] }
  0x7b   : > { %881 = vrcp.f32 %v314_v21  ;;  %379 = vst [vmem:[#allocation4] sm:$0x1] %v378_v24  ;;  %v519_v35 = vadd.f32 %v518_v32, %v517_v20 }
  0x7c   : > { %v450_v38 = vadd.f32 %v449_v2, %v440_v29  ;;  %v589_v40 = vadd.f32 %v588_v36, %v587_v0 }
  0x7d   : > { %v520_v39 = vrot.slane %v519_v35, 1 }
  0x7e   : > { %451 = vst [vmem:[#allocation4 + $0x1] sm:$0x1] %v450_v38  ;;  %v590_v44 = vrot.slane %v589_v40, 2 }
  0x7f   : > { %v521_v43 = vadd.f32 %v520_v39, %v519_v35 }
  0x80   : > { %v591_v49 = vadd.f32 %v590_v44, %v589_v40 }
  0x81   : > { %v522_v46 = vadd.f32 %v521_v43, %v512_v42 }
  0x82   : > { %v876_v45 = vpop.eup %875  ;;  %v592_v24 = vrot.slane %v591_v49, 1 }
  0x83   : > { %v878_v50 = vpop.eup %877  ;;  %v324_v53 = vmul.f32 %v876_v45, %v1215_v8  ;;  %v396_v54 = vmul.f32 %v876_v45, %v1244_v19  ;;  %v468_v55 = vmul.f32 %v876_v45, %v1276_v37  ;;  %v1315_v56 = vmul.f32 %v876_v45, %v868_v52  ;;  %523 = vst [vmem:[#allocation4 + $0x2] sm:$0x1] %v522_v46 }
  0x84   : > { %v880_v58 = vpop.eup %879  ;;  %v325_v59 = vmul.f32 %v878_v50, %v1222_v11  ;;  %v397_v60 = vmul.f32 %v878_v50, %v1250_v23  ;;  %v469_v63 = vmul.f32 %v878_v50, %v1281_v41  ;;  %v1320_v1 = vmul.f32 %v878_v50, %v870_v57 }
  0x85   : > { %v882_v7 = vpop.eup %881  ;;  %v326_v9 = vmul.f32 %v880_v58, %v1233_v15  ;;  %v398_v8 = vmul.f32 %v880_v58, %v1260_v27  ;;  %v470_v19 = vmul.f32 %v880_v58, %v1289_v31  ;;  %v1325_v37 = vmul.f32 %v880_v58, %v872_v62 }
  0x86   : > { %v327_v52 = vmul.f32 %v882_v7, %v1239_v18  ;;  %v357_v17 = vadd.f32 %v325_v59, %v324_v53  ;;  %v399_v11 = vmul.f32 %v882_v7, %v1268_v34  ;;  %v429_v23 = vadd.f32 %v397_v60, %v396_v54 }
  0x87   : > { %v471_v41 = vmul.f32 %v882_v7, %v1295_v48  ;;  %v501_v57 = vadd.f32 %v469_v63, %v468_v55  ;;  %v1330_v20 = vmul.f32 %v882_v7, %v874_v16  ;;  %v573_v15 = vadd.f32 %v1320_v1, %v1315_v56 }
  0x88   : > { %v358_v21 = vadd.f32 %v357_v17, %v326_v9  ;;  %v430_v27 = vadd.f32 %v429_v23, %v398_v8  ;;  %v341_v31 = vmul.f32 %v1199_v3, %v324_v53  ;;  %v342_v34 = vmul.f32 %v1202_v4, %v325_v59 }
  0x89   : > { %v502_v62 = vadd.f32 %v501_v57, %v470_v19  ;;  %v574_v18 = vadd.f32 %v573_v15, %v1325_v37  ;;  %v343_v29 = vmul.f32 %v1205_v5, %v326_v9  ;;  %v593_v16 = vadd.f32 %v592_v24, %v591_v49 }
  0x8a   : > { %v359_v48 = vadd.f32 %v358_v21, %v327_v52  ;;  %v431_v32 = vadd.f32 %v430_v27, %v399_v11  ;;  %v344_v0 = vmul.f32 %v1208_v6, %v327_v52  ;;  %v345_v36 = vadd.f32 %v342_v34, %v341_v31  ;;  %v428_v31 = vld [vmem:[#allocation3 + $0x1] sm:$0x1]  ;;  %v572_v34 = vld [vmem:[#allocation3 + $0x3] sm:$0x1] }
  0x8b   : > { %v503_v2 = vadd.f32 %v502_v62, %v471_v41  ;;  %v575_v35 = vadd.f32 %v574_v18, %v1330_v20  ;;  %v413_v38 = vmul.f32 %v1220_v10, %v396_v54  ;;  %v594_v40 = vadd.f32 %v593_v16, %v584_v28 }
  0x8c   : > { %v360_v3 = vrot.slane %v359_v48, 4  ;;  %v432_v39 = vrot.slane %v431_v32, 4  ;;  %v414_v42 = vmul.f32 %v1225_v12, %v397_v60  ;;  %v346_v44 = vadd.f32 %v345_v36, %v343_v29 }
  0x8d   : > { %v504_v43 = vrot.slane %v503_v2, 4  ;;  %v576_v4 = vrot.slane %v575_v35, 4  ;;  %v415_v5 = vmul.f32 %v1228_v13, %v398_v8  ;;  %595 = vst [vmem:[#allocation4 + $0x3] sm:$0x1] %v594_v40  ;;  %v416_v6 = vmul.f32 %v1231_v14, %v399_v11 }
  0x8e   : > { %v361_v45 = vadd.f32 %v360_v3, %v359_v48  ;;  %v433_v46 = vadd.f32 %v432_v39, %v431_v32  ;;  %v417_v49 = vadd.f32 %v414_v42, %v413_v38  ;;  %v347_v58 = vadd.f32 %v346_v44, %v344_v0  ;;  %v340_v42 = vld [vmem:[#allocation2] sm:$0x1] }
  0x8f   : > { %v505_v50 = vadd.f32 %v504_v43, %v503_v2  ;;  %v577_v53 = vadd.f32 %v576_v4, %v575_v35  ;;  %v485_v10 = vmul.f32 %v1248_v22, %v468_v55  ;;  %v486_v12 = vmul.f32 %v1255_v25, %v469_v63  ;;  %v356_v22 = vld [vmem:[#allocation3] sm:$0x1] }
  0x90   : > { %v362_v54 = vrot.slane %v361_v45, 2  ;;  %v434_v59 = vrot.slane %v433_v46, 2  ;;  %v418_v7 = vadd.f32 %v417_v49, %v415_v5  ;;  %v348_v52 = vrot.slane %v347_v58, 4 }
  0x91   : > { %v506_v60 = vrot.slane %v505_v50, 2  ;;  %v578_v9 = vrot.slane %v577_v53, 2  ;;  %v487_v13 = vmul.f32 %v1258_v26, %v470_v19  ;;  %v488_v14 = vmul.f32 %v1266_v33, %v471_v41  ;;  %v500_v19 = vld [vmem:[#allocation3 + $0x2] sm:$0x1] }
  0x92   : > { %v363_v8 = vadd.f32 %v362_v54, %v361_v45  ;;  %v435_v17 = vadd.f32 %v434_v59, %v433_v46  ;;  %v419_v23 = vadd.f32 %v418_v7, %v416_v6  ;;  %v349_v15 = vadd.f32 %v348_v52, %v347_v58  ;;  %v412_v46 = vld [vmem:[#allocation2 + $0x1] sm:$0x1] }
  0x93   : > { %v507_v11 = vadd.f32 %v506_v60, %v505_v50  ;;  %v579_v57 = vadd.f32 %v578_v9, %v577_v53  ;;  %v489_v21 = vadd.f32 %v486_v12, %v485_v10  ;;  %v557_v33 = vmul.f32 %v1287_v30, %v1315_v56 }
  0x94   : > { %v364_v55 = vrot.slane %v363_v8, 1  ;;  %v436_v27 = vrot.slane %v435_v17, 1  ;;  %v420_v24 = vrot.slane %v419_v23, 4  ;;  %v350_v62 = vrot.slane %v349_v15, 2 }
  0x95   : > { %v508_v25 = vrot.slane %v507_v11, 1  ;;  %v580_v63 = vrot.slane %v579_v57, 1  ;;  %v490_v18 = vadd.f32 %v489_v21, %v487_v13  ;;  %v558_v36 = vmul.f32 %v1293_v47, %v1320_v1 }
  0x96   : > { %v365_v28 = vadd.f32 %v364_v55, %v363_v8  ;;  %v437_v26 = vadd.f32 %v436_v27, %v435_v17  ;;  %v421_v29 = vadd.f32 %v420_v24, %v419_v23  ;;  %v351_v32 = vadd.f32 %v350_v62, %v349_v15  ;;  %v556_v8 = vld [vmem:[#allocation2 + $0x3] sm:$0x1] }
  0x97   : > { %v509_v41 = vadd.f32 %v508_v25, %v507_v11  ;;  %v581_v48 = vadd.f32 %v580_v63, %v579_v57  ;;  %v491_v16 = vadd.f32 %v490_v18, %v488_v14  ;;  %v559_v30 = vmul.f32 %v1300_v51, %v1325_v37 }
  0x98   : > { %v366_v0 = vadd.f32 %v365_v28, %v356_v22  ;;  %v438_v2 = vadd.f32 %v437_v26, %v428_v31  ;;  %v422_v35 = vrot.slane %v421_v29, 2  ;;  %v352_v39 = vrot.slane %v351_v32, 1 }
  0x99   : > { %v510_v38 = vadd.f32 %v509_v41, %v500_v19  ;;  %v582_v3 = vadd.f32 %v581_v48, %v572_v34  ;;  %v492_v40 = vrot.slane %v491_v16, 4  ;;  %v560_v56 = vmul.f32 %v1308_v61, %v1330_v20  ;;  %v608_v61 = vld [vmem:[#allocation4] sm:$0xf]  ;;  %v484_v20 = vld [vmem:[#allocation2 + $0x2] sm:$0x1] }
  0x9a   : > { %367 = vst [vmem:[#allocation3] sm:$0x1] %v366_v0  ;;  %439 = vst [vmem:[#allocation3 + $0x1] sm:$0x1] %v438_v2  ;;  %v423_v43 = vadd.f32 %v422_v35, %v421_v29  ;;  %v561_v4 = vadd.f32 %v558_v36, %v557_v33  ;;  %v353_v44 = vadd.f32 %v352_v39, %v351_v32  ;;  %v609_v60 = vsel %vm600_vm0, %v608_v61, 0.0 }
  0x9b   : > { %511 = vst [vmem:[#allocation3 + $0x2] sm:$0x1] %v510_v38  ;;  %583 = vst [vmem:[#allocation3 + $0x3] sm:$0x1] %v582_v3  ;;  %v493_v5 = vadd.f32 %v492_v40, %v491_v16 }
  0x9c   : > { %v424_v47 = vrot.slane %v423_v43, 1  ;;  %v562_v1 = vadd.f32 %v561_v4, %v559_v30  ;;  %v354_v45 = vadd.f32 %v353_v44, %v340_v42 }
  0x9d   : > { %v494_v6 = vrot.slane %v493_v5, 2 }
  0x9e   : > { %v425_v49 = vadd.f32 %v424_v47, %v423_v43  ;;  %v563_v50 = vadd.f32 %v562_v1, %v560_v56  ;;  %355 = vst [vmem:[#allocation2] sm:$0x1] %v354_v45 }
  0x9f   : > { %v495_v53 = vadd.f32 %v494_v6, %v493_v5 }
  0xa0   : > { %v426_v58 = vadd.f32 %v425_v49, %v412_v46  ;;  %v564_v51 = vrot.slane %v563_v50, 4 }
  0xa1   : > { %v496_v37 = vrot.slane %v495_v53, 1 }
  0xa2   : > { %v604_v10 = vld [vmem:[#allocation3] sm:$0xf]  ;;  %427 = vst [vmem:[#allocation2 + $0x1] sm:$0x1] %v426_v58  ;;  %v565_v54 = vadd.f32 %v564_v51, %v563_v50 }
  0xa3   : > { %v605_v59 = vsel %vm600_vm0, %v604_v10, 0.0  ;;  %v497_v7 = vadd.f32 %v496_v37, %v495_v53 }
  0xa4   : > { %606 = vadd.xlane.f32.xlu0 %v605_v59  ;;  %v566_v12 = vrot.slane %v565_v54, 2 }
  0xa5   : > { %v498_v9 = vadd.f32 %v497_v7, %v484_v20 }
  0xa6   : > { %v567_v52 = vadd.f32 %v566_v12, %v565_v54 }
  0xa7   : > { %499 = vst [vmem:[#allocation2 + $0x2] sm:$0x1] %v498_v9 }
  0xa8   : > { %610 = vadd.xlane.f32.xlu0 %v609_v60  ;;  %v568_v13 = vrot.slane %v567_v52, 1 }
  0xaa   : > { %v569_v17 = vadd.f32 %v568_v13, %v567_v52 }
  0xac   : > { %v570_v23 = vadd.f32 %v569_v17, %v556_v8 }
  0xae   : > { %571 = vst [vmem:[#allocation2 + $0x3] sm:$0x1] %v570_v23 }
  0xb5   : > { %v599_v14 = vld [vmem:[#allocation2] sm:$0xf] }
  0xb6   : > { %v601_v11 = vsel %vm600_vm0, %v599_v14, 0.0 }
  0xb7   : > { %602 = vadd.xlane.f32.xlu1 %v601_v11 }
 0x131   : > { %v607_v57 = vpop.xlane.xlu0 %606 }
 0x132   : > { %v776_v15 = vadd.f32 -960.0, %v607_v57 }
 0x135   : > { %v611_v21 = vpop.xlane.xlu0 %610 }
 0x136   : > { %v617_v22 = vadd.f32 %v776_v15, %v611_v21 }
 0x138   : > { %v618_v55 = vadd.f32 1.0, %v617_v22 }
 0x13a   : > { %883 = vrcp.f32 %v618_v55 }
 0x144   : > { %v603_v27 = vpop.xlane.xlu1 %602  ;;  %v884_v31 = vpop.eup %883 }
 0x145   : > { %v615_v24 = vmul.f32 2.0, %v603_v27 }
 0x147   : > { %v616_v25 = vadd.f32 1.0, %v615_v24 }
 0x149   : > { %v620_v63 = vmul.f32 %v884_v31, %v616_v25 }
 0x14b   : > { %v621_v62 = vsel %vm600_vm0, %v620_v63, 0.0 }
 0x14c   : > { %v622_v18 = vrot.slane %v621_v62, 4 }
 0x14e   : > { %v623_v28 = vadd.f32 %v622_v18, %v621_v62 }
 0x150   : > { %v624_v26 = vrot.slane %v623_v28, 2 }
 0x152   : > { %v625_v19 = vadd.f32 %v624_v26, %v623_v28 }
 0x154   : > { %v626_v34 = vrot.slane %v625_v19, 1 }
 0x156   : > { %v627_v29 = vadd.f32 %v626_v34, %v625_v19 }
 0x158   : > { %629 = vst.msk [vmem:[%s216_s5] sm:$0x1] %vm628_vm1, %v627_v29 }
 0x159 PF: > { %s18_s14 = sadd.s32 1, %s999_s14   ;;  %s1393_s9 = smov %s983_s10 }
 0x15a   : > { %p15_p9 = scmp.ge.s32.totalorder %s18_s14, 4   ;;  %s1394_s10 = smov %s987_s11 }
 0x15b   : > { %s1395_s11 = smov %s1070_s21  ;;  %s1396_s12 = smov %s995_s13 }
 0x15c   : > { %s1397_s13 = smov %s1399_s16  ;;  %17 = sbr.rel (!%p15_p9) target bundleno = 6 (0x6), region = 92 }
 0x163   :  { %647 = vsyncpa [#allocation6], 1 }
 0x164   :  { %649 = vsyncpa [#allocation6 + $0x1], 1 }
 0x165   :  { %650 = vsyncpa [#allocation8], 1 }
 0x166   :  { %652 = vsyncpa [#allocation8 + $0x1], 1 }

</bundles_post_ra>
